<compile_context>
chip_gen: v7x
topology: tpu7x:2x2x1
jax: 0.10.0
libtpu: 0.0.40
codegen_flags: <defaults>
</compile_context>

<pallas_src>
import functools
import math

import jax
import jax.numpy as jnp
from jax.experimental import pallas as pl
from jax.experimental.pallas import tpu as pltpu


LOG_SIG_MIN = -20.0
LOG_SIG_MAX = 2.0


def _round_up(x, m):
    return (x + m - 1) // m * m


# ---------------------------------------------------------------------------
# Fused kernel: entire policy forward for one batch tile.
# ---------------------------------------------------------------------------
def _make_policy_kernel(num_fc_layers):
    """Builds a kernel for `num_fc_layers` Linear+ReLU trunk layers.

    Ref layout (inputs then outputs):
      state, goal,
      w1_state, w1_goal, b1,                       # first Linear (concat folded)
      (w_i, b_i) for each remaining trunk layer,
      w_mean, b_mean, w_logstd, b_logstd,
      mean_out, std_out
    """

    def kernel(*refs):
        s_ref, g_ref = refs[0], refs[1]
        w1s_ref, w1g_ref, b1_ref = refs[2], refs[3], refs[4]

        # Layer 1: relu(cat([s, g], -1) @ W1 + b1) == relu(s@W1s + g@W1g + b1)
        h = jnp.dot(s_ref[...], w1s_ref[...], preferred_element_type=jnp.float32)
        h = h + jnp.dot(g_ref[...], w1g_ref[...], preferred_element_type=jnp.float32)
        h = jnp.maximum(h + b1_ref[...], 0.0)

        idx = 5
        for _ in range(num_fc_layers - 1):
            w_ref, b_ref = refs[idx], refs[idx + 1]
            idx += 2
            h = jnp.dot(h, w_ref[...], preferred_element_type=jnp.float32)
            h = jnp.maximum(h + b_ref[...], 0.0)

        wm_ref, bm_ref = refs[idx], refs[idx + 1]
        wl_ref, bl_ref = refs[idx + 2], refs[idx + 3]
        mean_ref, std_ref = refs[idx + 4], refs[idx + 5]

        mean = jnp.dot(h, wm_ref[...], preferred_element_type=jnp.float32) + bm_ref[...]
        log_std = jnp.dot(h, wl_ref[...], preferred_element_type=jnp.float32) + bl_ref[...]
        log_std = jnp.clip(log_std, LOG_SIG_MIN, LOG_SIG_MAX)

        mean_ref[...] = mean.astype(mean_ref.dtype)
        std_ref[...] = jnp.exp(log_std).astype(std_ref.dtype)

    return kernel


# ---------------------------------------------------------------------------
# Wrapper: batch-tiled single pallas_call.
# ---------------------------------------------------------------------------
def gaussian_policy_forward(state, goal, params, *, block_m=256):
    """state, goal: (B, state_dim) f32 -> (mean, std), each (B, action_dim)."""
    B, S = state.shape
    A = params["b_mean"].shape[-1]
    num_fc_layers = 1 + len(params["fc"])

    # Batch tile: multiple of 8 sublanes, capped at block_m rows.
    bm = min(block_m, _round_up(B, 8))
    b_pad = _round_up(B, bm)
    if b_pad != B:
        pad = ((0, b_pad - B), (0, 0))
        state = jnp.pad(state, pad)
        goal = jnp.pad(goal, pad)

    def row_spec(shape):
        return pl.BlockSpec(shape, lambda i: (i, 0))

    def full_spec(arr):
        return pl.BlockSpec(arr.shape, lambda i: (0, 0))

    args = [state, goal, params["w1_state"], params["w1_goal"], params["b1"]]
    in_specs = [
        row_spec((bm, S)),
        row_spec((bm, S)),
        full_spec(params["w1_state"]),
        full_spec(params["w1_goal"]),
        full_spec(params["b1"]),
    ]
    for w, b in params["fc"]:
        args += [w, b]
        in_specs += [full_spec(w), full_spec(b)]
    args += [params["w_mean"], params["b_mean"],
             params["w_logstd"], params["b_logstd"]]
    in_specs += [full_spec(params["w_mean"]), full_spec(params["b_mean"]),
                 full_spec(params["w_logstd"]), full_spec(params["b_logstd"])]

    mean, std = pl.pallas_call(
        _make_policy_kernel(num_fc_layers),
        out_shape=(jax.ShapeDtypeStruct((b_pad, A), jnp.float32),
                   jax.ShapeDtypeStruct((b_pad, A), jnp.float32)),
        grid=(b_pad // bm,),
        in_specs=in_specs,
        out_specs=(row_spec((bm, A)), row_spec((bm, A))),
        compiler_params=pltpu.CompilerParams(
            dimension_semantics=("parallel",)),   # lets v7x shard batch tiles
    )(*args)

    return mean[:B], std[:B]


# ---------------------------------------------------------------------------
# sample(): elementwise post-processing on the kernel's (mean, std).
# ---------------------------------------------------------------------------
def gaussian_policy_sample(key, state, goal, params):
    mean, std = gaussian_policy_forward(state, goal, params)
    eps = jax.random.normal(key, mean.shape, mean.dtype)
    x_t = mean + std * eps                                  # rsample
    action = jnp.tanh(x_t)
    log_prob = (-0.5 * ((x_t - mean) / std) ** 2
                - jnp.log(std) - 0.5 * math.log(2.0 * math.pi))
    log_prob = log_prob - jnp.log(1.0 - action ** 2 + 1e-6)
    log_prob = jnp.sum(log_prob, axis=-1, keepdims=True)
    return action, log_prob, jnp.tanh(mean)


# ---------------------------------------------------------------------------
# Parameter init (mirrors nn.Linear default U(-1/sqrt(fan_in), 1/sqrt(fan_in)))
# with all forward-path weight massaging done here, once.
# ---------------------------------------------------------------------------
def _linear_init(key, fan_in, fan_out):
    kw, kb = jax.random.split(key)
    bound = 1.0 / math.sqrt(fan_in)
    w = jax.random.uniform(kw, (fan_in, fan_out), jnp.float32, -bound, bound)
    b = jax.random.uniform(kb, (1, fan_out), jnp.float32, -bound, bound)
    return w, b


def init_policy_params(key, state_dim, action_dim, hidden_dims=(256, 256)):
    hidden_dims = list(hidden_dims)
    n = len(hidden_dims)
    keys = jax.random.split(key, n + 2)

    # First Linear(2*state_dim, h0): pre-split along the input axis so the
    # [state, goal] concat is folded into the weights.
    w1, b1 = _linear_init(keys[0], 2 * state_dim, hidden_dims[0])
    params = {
        "w1_state": w1[:state_dim],
        "w1_goal": w1[state_dim:],
        "b1": b1,
        "fc": [],
    }
    for i, (din, dout) in enumerate(zip(hidden_dims[:-1], hidden_dims[1:])):
        w, b = _linear_init(keys[1 + i], din, dout)
        params["fc"].append((w, b))

    w_mean, b_mean = _linear_init(keys[n], hidden_dims[-1], action_dim)
    w_logstd, b_logstd = _linear_init(keys[n + 1], hidden_dims[-1], action_dim)
    params.update({"w_mean": w_mean, "b_mean": b_mean,
                   "w_logstd": w_logstd, "b_logstd": b_logstd})
    return params


# ---------------------------------------------------------------------------
# Pure-JAX reference for correctness checking.
# ---------------------------------------------------------------------------
def gaussian_policy_reference(state, goal, params):
    w1 = jnp.concatenate([params["w1_state"], params["w1_goal"]], axis=0)
    x = jnp.concatenate([state, goal], axis=-1)
    h = jax.nn.relu(x @ w1 + params["b1"])
    for w, b in params["fc"]:
        h = jax.nn.relu(h @ w + b)
    mean = h @ params["w_mean"] + params["b_mean"]
    log_std = jnp.clip(h @ params["w_logstd"] + params["b_logstd"],
                       LOG_SIG_MIN, LOG_SIG_MAX)
    return mean, jnp.exp(log_std)


if __name__ == "__main__":
    key = jax.random.PRNGKey(0)
    k_params, k_state, k_goal, k_sample = jax.random.split(key, 4)

    batch, state_dim, action_dim = 2, 16, 8
    params = init_policy_params(k_params, state_dim, action_dim,
                                hidden_dims=(256, 256))
    state = jax.random.normal(k_state, (batch, state_dim), jnp.float32)
    goal = jax.random.normal(k_goal, (batch, state_dim), jnp.float32)

    fwd = jax.jit(gaussian_policy_forward)
    mean, std = jax.block_until_ready(fwd(state, goal, params))
    assert mean.shape == (batch, action_dim), mean.shape
    assert std.shape == (batch, action_dim), std.shape

    mean_ref, std_ref = gaussian_policy_reference(state, goal, params)
    assert jnp.allclose(mean, mean_ref, atol=1e-4, rtol=1e-4), (
        float(jnp.max(jnp.abs(mean - mean_ref))))
    assert jnp.allclose(std, std_ref, atol=1e-4, rtol=1e-4), (
        float(jnp.max(jnp.abs(std - std_ref))))

    # Exercise the sample() path (reparameterized, tanh-squashed).
    action, log_prob, mean_tanh = gaussian_policy_sample(k_sample, state, goal, params)
    jax.block_until_ready((action, log_prob, mean_tanh))
    assert action.shape == (batch, action_dim)
    assert log_prob.shape == (batch, 1)
    assert bool(jnp.all(jnp.isfinite(log_prob)))

    print("KERNEL_OK")
</pallas_src>

<mosaic_0001>
module attributes {stable_mosaic.version = 11 : i64} {
  func.func @kernel(%arg0: i32, %arg1: memref<8x16xf32, #tpu.memory_space<vmem>>, %arg2: memref<8x16xf32, #tpu.memory_space<vmem>>, %arg3: memref<16x256xf32, #tpu.memory_space<vmem>>, %arg4: memref<16x256xf32, #tpu.memory_space<vmem>>, %arg5: memref<1x256xf32, #tpu.memory_space<vmem>>, %arg6: memref<256x256xf32, #tpu.memory_space<vmem>>, %arg7: memref<1x256xf32, #tpu.memory_space<vmem>>, %arg8: memref<256x8xf32, #tpu.memory_space<vmem>>, %arg9: memref<1x8xf32, #tpu.memory_space<vmem>>, %arg10: memref<256x8xf32, #tpu.memory_space<vmem>>, %arg11: memref<1x8xf32, #tpu.memory_space<vmem>>, %arg12: memref<8x8xf32, #tpu.memory_space<vmem>>, %arg13: memref<8x8xf32, #tpu.memory_space<vmem>>) attributes {dimension_semantics = [#tpu.dimension_semantics<parallel>], iteration_bounds = array<i64: 1>, scalar_prefetch = 0 : i64, scratch_operands = 0 : i64, tpu.core_type = #tpu.core_type<tc>, window_params = [{transform_indices = @transform_0, window_bounds = array<i64: 8, 16>}, {transform_indices = @transform_1, window_bounds = array<i64: 8, 16>}, {pipeline_mode = #tpu.pipeline_mode<synchronous>, transform_indices = @transform_2, window_bounds = array<i64: 16, 256>}, {pipeline_mode = #tpu.pipeline_mode<synchronous>, transform_indices = @transform_3, window_bounds = array<i64: 16, 256>}, {pipeline_mode = #tpu.pipeline_mode<synchronous>, transform_indices = @transform_4, window_bounds = array<i64: 1, 256>}, {pipeline_mode = #tpu.pipeline_mode<synchronous>, transform_indices = @transform_5, window_bounds = array<i64: 256, 256>}, {pipeline_mode = #tpu.pipeline_mode<synchronous>, transform_indices = @transform_6, window_bounds = array<i64: 1, 256>}, {pipeline_mode = #tpu.pipeline_mode<synchronous>, transform_indices = @transform_7, window_bounds = array<i64: 256, 8>}, {pipeline_mode = #tpu.pipeline_mode<synchronous>, transform_indices = @transform_8, window_bounds = array<i64: 1, 8>}, {pipeline_mode = #tpu.pipeline_mode<synchronous>, transform_indices = @transform_9, window_bounds = array<i64: 256, 8>}, {pipeline_mode = #tpu.pipeline_mode<synchronous>, transform_indices = @transform_10, window_bounds = array<i64: 1, 8>}, {transform_indices = @transform_11, window_bounds = array<i64: 8, 8>}, {transform_indices = @transform_12, window_bounds = array<i64: 8, 8>}]} {
    %c0 = arith.constant 0 : index
    %c0_0 = arith.constant 0 : index
    %0 = vector.load %arg1[%c0, %c0_0] : memref<8x16xf32, #tpu.memory_space<vmem>>, vector<8x16xf32>
    %c0_1 = arith.constant 0 : index
    %c0_2 = arith.constant 0 : index
    %1 = vector.load %arg3[%c0_1, %c0_2] : memref<16x256xf32, #tpu.memory_space<vmem>>, vector<16x256xf32>
    %cst = arith.constant dense<0.000000e+00> : vector<8x256xf32>
    %2 = tpu.matmul %0, %1, %cst {dimension_numbers = #tpu.dot_dimension_numbers<[1], [0], [0], [1], [0, 0, 1, 1], [], []>} : vector<8x16xf32>, vector<16x256xf32>, vector<8x256xf32> -> vector<8x256xf32>
    %c0_3 = arith.constant 0 : index
    %c0_4 = arith.constant 0 : index
    %3 = vector.load %arg2[%c0_3, %c0_4] : memref<8x16xf32, #tpu.memory_space<vmem>>, vector<8x16xf32>
    %c0_5 = arith.constant 0 : index
    %c0_6 = arith.constant 0 : index
    %4 = vector.load %arg4[%c0_5, %c0_6] : memref<16x256xf32, #tpu.memory_space<vmem>>, vector<16x256xf32>
    %cst_7 = arith.constant dense<0.000000e+00> : vector<8x256xf32>
    %5 = tpu.matmul %3, %4, %cst_7 {dimension_numbers = #tpu.dot_dimension_numbers<[1], [0], [0], [1], [0, 0, 1, 1], [], []>} : vector<8x16xf32>, vector<16x256xf32>, vector<8x256xf32> -> vector<8x256xf32>
    %6 = arith.addf %2, %5 : vector<8x256xf32>
    %c0_8 = arith.constant 0 : index
    %c0_9 = arith.constant 0 : index
    %7 = vector.load %arg5[%c0_8, %c0_9] : memref<1x256xf32, #tpu.memory_space<vmem>>, vector<1x256xf32>
    %8 = vector.broadcast %7 : vector<1x256xf32> to vector<8x256xf32>
    %9 = arith.addf %6, %8 : vector<8x256xf32>
    %cst_10 = arith.constant 0.000000e+00 : f32
    %10 = vector.broadcast %cst_10 : f32 to vector<8x256xf32>
    %11 = arith.maximumf %9, %10 : vector<8x256xf32>
    %c0_11 = arith.constant 0 : index
    %c0_12 = arith.constant 0 : index
    %12 = vector.load %arg6[%c0_11, %c0_12] : memref<256x256xf32, #tpu.memory_space<vmem>>, vector<256x256xf32>
    %cst_13 = arith.constant dense<0.000000e+00> : vector<8x256xf32>
    %13 = tpu.matmul %11, %12, %cst_13 {dimension_numbers = #tpu.dot_dimension_numbers<[1], [0], [0], [1], [0, 0, 1, 1], [], []>} : vector<8x256xf32>, vector<256x256xf32>, vector<8x256xf32> -> vector<8x256xf32>
    %c0_14 = arith.constant 0 : index
    %c0_15 = arith.constant 0 : index
    %14 = vector.load %arg7[%c0_14, %c0_15] : memref<1x256xf32, #tpu.memory_space<vmem>>, vector<1x256xf32>
    %15 = vector.broadcast %14 : vector<1x256xf32> to vector<8x256xf32>
    %16 = arith.addf %13, %15 : vector<8x256xf32>
    %cst_16 = arith.constant 0.000000e+00 : f32
    %17 = vector.broadcast %cst_16 : f32 to vector<8x256xf32>
    %18 = arith.maximumf %16, %17 : vector<8x256xf32>
    %c0_17 = arith.constant 0 : index
    %c0_18 = arith.constant 0 : index
    %19 = vector.load %arg8[%c0_17, %c0_18] : memref<256x8xf32, #tpu.memory_space<vmem>>, vector<256x8xf32>
    %cst_19 = arith.constant dense<0.000000e+00> : vector<8x8xf32>
    %20 = tpu.matmul %18, %19, %cst_19 {dimension_numbers = #tpu.dot_dimension_numbers<[1], [0], [0], [1], [0, 0, 1, 1], [], []>} : vector<8x256xf32>, vector<256x8xf32>, vector<8x8xf32> -> vector<8x8xf32>
    %c0_20 = arith.constant 0 : index
    %c0_21 = arith.constant 0 : index
    %21 = vector.load %arg9[%c0_20, %c0_21] : memref<1x8xf32, #tpu.memory_space<vmem>>, vector<1x8xf32>
    %22 = vector.broadcast %21 : vector<1x8xf32> to vector<8x8xf32>
    %23 = arith.addf %20, %22 : vector<8x8xf32>
    %c0_22 = arith.constant 0 : index
    %c0_23 = arith.constant 0 : index
    %24 = vector.load %arg10[%c0_22, %c0_23] : memref<256x8xf32, #tpu.memory_space<vmem>>, vector<256x8xf32>
    %cst_24 = arith.constant dense<0.000000e+00> : vector<8x8xf32>
    %25 = tpu.matmul %18, %24, %cst_24 {dimension_numbers = #tpu.dot_dimension_numbers<[1], [0], [0], [1], [0, 0, 1, 1], [], []>} : vector<8x256xf32>, vector<256x8xf32>, vector<8x8xf32> -> vector<8x8xf32>
    %c0_25 = arith.constant 0 : index
    %c0_26 = arith.constant 0 : index
    %26 = vector.load %arg11[%c0_25, %c0_26] : memref<1x8xf32, #tpu.memory_space<vmem>>, vector<1x8xf32>
    %27 = vector.broadcast %26 : vector<1x8xf32> to vector<8x8xf32>
    %28 = arith.addf %25, %27 : vector<8x8xf32>
    %cst_27 = arith.constant -2.000000e+01 : f32
    %cst_28 = arith.constant 2.000000e+00 : f32
    %29 = vector.broadcast %cst_27 : f32 to vector<8x8xf32>
    %30 = arith.maximumf %29, %28 : vector<8x8xf32>
    %31 = vector.broadcast %cst_28 : f32 to vector<8x8xf32>
    %32 = arith.minimumf %31, %30 : vector<8x8xf32>
    %c0_29 = arith.constant 0 : index
    %c0_30 = arith.constant 0 : index
    %33 = vector.load %arg12[%c0_29, %c0_30] : memref<8x8xf32, #tpu.memory_space<vmem>>, vector<8x8xf32>
    tpu.vector_store %arg12[%c0_29, %c0_30], %23 {strides = array<i32>} : memref<8x8xf32, #tpu.memory_space<vmem>>, vector<8x8xf32>,
    %34 = math.exp %32 : vector<8x8xf32>
    %c0_31 = arith.constant 0 : index
    %c0_32 = arith.constant 0 : index
    %35 = vector.load %arg13[%c0_31, %c0_32] : memref<8x8xf32, #tpu.memory_space<vmem>>, vector<8x8xf32>
    tpu.vector_store %arg13[%c0_31, %c0_32], %34 {strides = array<i32>} : memref<8x8xf32, #tpu.memory_space<vmem>>, vector<8x8xf32>,
    return
  }
  func.func @transform_0(%arg0: i32) -> (i32, i32) {
    %c0_i32 = arith.constant 0 : i32
    %c0_i32_0 = arith.constant 0 : i32
    return %arg0, %c0_i32 : i32, i32
  }
  func.func @transform_1(%arg0: i32) -> (i32, i32) {
    %c0_i32 = arith.constant 0 : i32
    %c0_i32_0 = arith.constant 0 : i32
    return %arg0, %c0_i32 : i32, i32
  }
  func.func @transform_2(%arg0: i32) -> (i32, i32) {
    %c0_i32 = arith.constant 0 : i32
    %c0_i32_0 = arith.constant 0 : i32
    %c0_i32_1 = arith.constant 0 : i32
    return %c0_i32, %c0_i32_0 : i32, i32
  }
  func.func @transform_3(%arg0: i32) -> (i32, i32) {
    %c0_i32 = arith.constant 0 : i32
    %c0_i32_0 = arith.constant 0 : i32
    %c0_i32_1 = arith.constant 0 : i32
    return %c0_i32, %c0_i32_0 : i32, i32
  }
  func.func @transform_4(%arg0: i32) -> (i32, i32) {
    %c0_i32 = arith.constant 0 : i32
    %c0_i32_0 = arith.constant 0 : i32
    %c0_i32_1 = arith.constant 0 : i32
    return %c0_i32, %c0_i32_0 : i32, i32
  }
  func.func @transform_5(%arg0: i32) -> (i32, i32) {
    %c0_i32 = arith.constant 0 : i32
    %c0_i32_0 = arith.constant 0 : i32
    %c0_i32_1 = arith.constant 0 : i32
    return %c0_i32, %c0_i32_0 : i32, i32
  }
  func.func @transform_6(%arg0: i32) -> (i32, i32) {
    %c0_i32 = arith.constant 0 : i32
    %c0_i32_0 = arith.constant 0 : i32
    %c0_i32_1 = arith.constant 0 : i32
    return %c0_i32, %c0_i32_0 : i32, i32
  }
  func.func @transform_7(%arg0: i32) -> (i32, i32) {
    %c0_i32 = arith.constant 0 : i32
    %c0_i32_0 = arith.constant 0 : i32
    %c0_i32_1 = arith.constant 0 : i32
    return %c0_i32, %c0_i32_0 : i32, i32
  }
  func.func @transform_8(%arg0: i32) -> (i32, i32) {
    %c0_i32 = arith.constant 0 : i32
    %c0_i32_0 = arith.constant 0 : i32
    %c0_i32_1 = arith.constant 0 : i32
    return %c0_i32, %c0_i32_0 : i32, i32
  }
  func.func @transform_9(%arg0: i32) -> (i32, i32) {
    %c0_i32 = arith.constant 0 : i32
    %c0_i32_0 = arith.constant 0 : i32
    %c0_i32_1 = arith.constant 0 : i32
    return %c0_i32, %c0_i32_0 : i32, i32
  }
  func.func @transform_10(%arg0: i32) -> (i32, i32) {
    %c0_i32 = arith.constant 0 : i32
    %c0_i32_0 = arith.constant 0 : i32
    %c0_i32_1 = arith.constant 0 : i32
    return %c0_i32, %c0_i32_0 : i32, i32
  }
  func.func @transform_11(%arg0: i32) -> (i32, i32) {
    %c0_i32 = arith.constant 0 : i32
    %c0_i32_0 = arith.constant 0 : i32
    return %arg0, %c0_i32 : i32, i32
  }
  func.func @transform_12(%arg0: i32) -> (i32, i32) {
    %c0_i32 = arith.constant 0 : i32
    %c0_i32_0 = arith.constant 0 : i32
    return %arg0, %c0_i32 : i32, i32
  }
}

</mosaic_0001>

<bundles_post_ra>
// kernel: gaussian_policy_forward.1
= control target key start
LH: loop header
LB: loop body
LE: loop exit
PB: predicated region body
PF: predicated region fallthrough
CT: control target
= control target key end

     0   :  { %18 = vsyncpa [#allocation3], 0  ;;  %s1501_s0 = inlined_call_operand.vmem [shape: f32[8,16], index: 0, kind: input, shape index: {}]   ;;  %s1502_s1 = inlined_call_operand.vmem [shape: f32[8,16], index: 1, kind: input, shape index: {}]   ;;  %s1503_s2 = inlined_call_operand.vmem [shape: f32[16,256], index: 2, kind: input, shape index: {}]   ;;  %s1504_s3 = inlined_call_operand.vmem [shape: f32[16,256], index: 3, kind: input, shape index: {}]   ;;  %s1505_s4 = inlined_call_operand.hbm [shape: f32[1,256], index: 4, kind: input, shape index: {}]   ;;  %s1506_s5 = inlined_call_operand.vmem [shape: f32[256,256], index: 5, kind: input, shape index: {}]   ;;  %s1507_s6 = inlined_call_operand.hbm [shape: f32[1,256], index: 6, kind: input, shape index: {}]   ;;  %s1508_s7 = inlined_call_operand.vmem [shape: f32[256,8], index: 7, kind: input, shape index: {}]   ;;  %s1509_s8 = inlined_call_operand.hbm [shape: f32[1,8], index: 8, kind: input, shape index: {}]   ;;  %s1510_s9 = inlined_call_operand.vmem [shape: f32[256,8], index: 9, kind: input, shape index: {}]   ;;  %s1511_s10 = inlined_call_operand.hbm [shape: f32[1,8], index: 10, kind: input, shape index: {}]   ;;  %s1512_s11 = inlined_call_operand.vmem [shape: f32[8,8], index: 11, kind: output, shape index: {0}]   ;;  %s1513_s12 = inlined_call_operand.vmem [shape: f32[8,8], index: 12, kind: output, shape index: {1}]  }
   0x1   :  { %19 = vsyncpa [#allocation5], 0 }
   0x2   :  { %20 = vsyncpa [#allocation8], 0  ;;  %s960_s21 = smov [#allocation4]   ;;  %s961_s23 = smov [#allocation2]  }
   0x3   :  { %s47_s22 = sshll.u32 %s960_s21, 4  ;;  %s35_s24 = sshll.u32 %s961_s23, 4  ;;  %s48_s22 = int_to_ptr.vmem [resolvable:$true] %s47_s22  ;;  %s36_s24 = int_to_ptr.vmem [resolvable:$true] %s35_s24 }
   0x4   :  { %s866_s27 = scalar_lea.hbm %s1507_s6, 32 }
   0x5   :  { %p867_p0 = scmp.ne.s32.totalorder %s1507_s6, %s866_s27  ;;  %p870_p1 = scmp.lt.u32.totalorder %s866_s27, %s1507_s6 }
   0x7   :  { %p872_p2 = pnand %p870_p1, %p867_p0 }
   0x9   :  { %875 = shalt.err (!%p872_p2)
}
   0xa   :  { %s876_s14 = scalar_lea.vmem %s48_s22, 32  ;;  %p881_p4 = scmp.lt.s32.totalorder %s48_s22, %s48_s22 }
   0xb   :  { %p877_p3 = scmp.ne.s32.totalorder %s48_s22, %s876_s14  ;;  %p882_p5 = scmp.lt.s32.totalorder %s876_s14, %s876_s14 }
   0xd   :  { %p883_p6 = por %p882_p5, %p881_p4 }
   0xf   :  { %p884_p7 = pnand %p883_p6, %p877_p3 }
  0x11   :  { %887 = shalt.err (!%p884_p7)
}
  0x12   :  { %50 = dma.hbm_to_vmem [thread:$0]  %s1507_s6, 32, %s48_s22, [#allocation5]  }
  0x13   :  { %s888_s19 = scalar_lea.hbm %s1505_s4, 32 }
  0x14   :  { %p889_p8 = scmp.ne.s32.totalorder %s1505_s4, %s888_s19  ;;  %p892_p9 = scmp.lt.u32.totalorder %s888_s19, %s1505_s4 }
  0x16   :  { %p894_p10 = pnand %p892_p9, %p889_p8 }
  0x18   :  { %897 = shalt.err (!%p894_p10)
}
  0x19   :  { %s898_s26 = scalar_lea.vmem %s36_s24, 32  ;;  %p903_p12 = scmp.lt.s32.totalorder %s36_s24, %s36_s24 }
  0x1a   :  { %p899_p11 = scmp.ne.s32.totalorder %s36_s24, %s898_s26  ;;  %p904_p13 = scmp.lt.s32.totalorder %s898_s26, %s898_s26 }
  0x1c   :  { %p905_p0 = por %p904_p13, %p903_p12 }
  0x1e   :  { %p906_p1 = pnand %p905_p0, %p899_p11 }
  0x20   :  { %909 = shalt.err (!%p906_p1)
}
  0x21   :  { %38 = dma.hbm_to_vmem [thread:$0]  %s1505_s4, 32, %s36_s24, [#allocation3]  }
  0x22   :  { %s962_s27 = smov [#allocation6]   ;;  %s963_s29 = smov [#allocation7]  }
  0x23   :  { %s59_s28 = sshll.u32 %s962_s27, 4  ;;  %s71_s30 = sshll.u32 %s963_s29, 4  ;;  %s60_s28 = int_to_ptr.vmem [resolvable:$true] %s59_s28  ;;  %s72_s30 = int_to_ptr.vmem [resolvable:$true] %s71_s30 }
  0x24   :  { %s910_s15 = scalar_lea.hbm %s1509_s8, 16 }
  0x25   :  { %p911_p2 = scmp.ne.s32.totalorder %s1509_s8, %s910_s15  ;;  %p914_p3 = scmp.lt.u32.totalorder %s910_s15, %s1509_s8 }
  0x27   :  { %p916_p4 = pnand %p914_p3, %p911_p2 }
  0x29   :  { %919 = shalt.err (!%p916_p4)
}
  0x2a   :  { %s920_s4 = scalar_lea.vmem %s60_s28, 16  ;;  %s924_s24 = scalar_lea.vmem %s60_s28, 32 }
  0x2b   :  { %p921_p5 = scmp.ne.s32.totalorder %s60_s28, %s920_s4  ;;  %p925_p6 = scmp.lt.s32.totalorder %s60_s28, %s60_s28 }
  0x2c   :  { %p926_p7 = scmp.lt.s32.totalorder %s924_s24, %s920_s4 }
  0x2e   :  { %p927_p8 = por %p926_p7, %p925_p6 }
  0x30   :  { %p928_p9 = pnand %p927_p8, %p921_p5 }
  0x32   :  { %931 = shalt.err (!%p928_p9)
}
  0x33   :  { %62 = dma.hbm_to_vmem [thread:$0]  %s1509_s8, 16, %s60_s28, [#allocation5]  }
  0x34   :  { %s932_s26 = scalar_lea.hbm %s1511_s10, 16 }
  0x35   :  { %p933_p10 = scmp.ne.s32.totalorder %s1511_s10, %s932_s26  ;;  %p936_p11 = scmp.lt.u32.totalorder %s932_s26, %s1511_s10 }
  0x37   :  { %p938_p12 = pnand %p936_p11, %p933_p10 }
  0x39   :  { %941 = shalt.err (!%p938_p12)
}
  0x3a   :  { %s942_s13 = scalar_lea.vmem %s72_s30, 16  ;;  %s946_s14 = scalar_lea.vmem %s72_s30, 32 }
  0x3b   :  { %p943_p13 = scmp.ne.s32.totalorder %s72_s30, %s942_s13  ;;  %p947_p0 = scmp.lt.s32.totalorder %s72_s30, %s72_s30 }
  0x3c   :  { %p948_p1 = scmp.lt.s32.totalorder %s946_s14, %s942_s13 }
  0x3e   :  { %p949_p2 = por %p948_p1, %p947_p0 }
  0x40   :  { %p950_p3 = pnand %p949_p2, %p943_p13 }
  0x42   :  { %953 = shalt.err (!%p950_p3)
}
  0x43   :  { %74 = dma.hbm_to_vmem [thread:$0]  %s1511_s10, 16, %s72_s30, [#allocation8]  }
  0x44   :  { %954 = dma.done.wait [#allocation3], 32  }
  0x45   :  { %955 = vsyncadd [#allocation3], 4294967264 }
  0x46   :  { %956 = dma.done.wait [#allocation5], 48  }
  0x47   :  { %957 = vsyncadd [#allocation5], 4294967248 }
  0x48   :  { %958 = dma.done.wait [#allocation8], 16  }
  0x49   :  { %959 = vsyncadd [#allocation8], 4294967280  ;;  %v964_v0 = vmov 0.0   ;;  %v94_v1 = vld [vmem:[%s1504_s3 + $0x8] sm:$0xff]  ;;  %v96_v2 = vld [vmem:[%s1504_s3 + $0x18] sm:$0xff]  ;;  %vm97_vm0 = vcmask 130048  }
  0x4a   :  { %165 = vmatprep.mubr.f32.mxu1 %v964_v0  ;;  %239 = vmatprep.mubr.f32.mxu0 %v964_v0  ;;  %v89_v3 = vld [vmem:[%s1503_s2 + $0x8] sm:$0xff]  ;;  %v721_v4 = vpack.c.bf16 %v96_v2, %v94_v1  ;;  %v91_v5 = vld [vmem:[%s1503_s2 + $0x18] sm:$0xff]  ;;  %v93_v6 = vld [vmem:[%s1504_s3] sm:$0xff]  ;;  %vm631_vm1 = vcmask 64512  }
  0x4b   :  { %v95_v7 = vld [vmem:[%s1504_s3 + $0x10] sm:$0xff]  ;;  %v725_v8 = vpack.c.bf16 %v91_v5, %v89_v3  ;;  %v88_v10 = vld [vmem:[%s1503_s2] sm:$0xff]  ;;  %v263_v15 = vld [vmem:[%s1506_s5 + $0x8] sm:$0xff] }
  0x4c   :  { %v723_v9 = vpack.c.bf16 %v95_v7, %v93_v6  ;;  %v90_v11 = vld [vmem:[%s1503_s2 + $0x10] sm:$0xff]  ;;  %v92_v12 = vld [vmem:[%s1502_s1] sm:$0xff]  ;;  %722 = vmatprep.subr.bf16.mxu1 %v721_v4  ;;  %v265_v16 = vld [vmem:[%s1506_s5 + $0x18] sm:$0xff] }
  0x4d   :  { %v727_v13 = vpack.c.bf16 %v90_v11, %v88_v10  ;;  %v87_v14 = vld [vmem:[%s1501_s0] sm:$0xff]  ;;  %726 = vmatprep.subr.bf16.mxu0 %v725_v8  ;;  %v729_v17 = vpack.c.bf16 %v265_v16, %v263_v15  ;;  %v264_v19 = vld [vmem:[%s1506_s5 + $0x10] sm:$0xff]  ;;  %v267_v20 = vld [vmem:[%s1506_s5 + $0x28] sm:$0xff] }
  0x4e   :  { %724 = vmatpush1.bf16.msra.mxu1 %v723_v9  ;;  %v262_v18 = vld [vmem:[%s1506_s5] sm:$0xff]  ;;  %v269_v22 = vld [vmem:[%s1506_s5 + $0x38] sm:$0xff]  ;;  %v268_v24 = vld [vmem:[%s1506_s5 + $0x30] sm:$0xff] }
  0x4f   :  { %728 = vmatpush1.bf16.msra.mxu0 %v727_v13  ;;  %v731_v21 = vpack.c.bf16 %v264_v19, %v262_v18  ;;  %v266_v23 = vld [vmem:[%s1506_s5 + $0x20] sm:$0xff]  ;;  %730 = vmatprep.subr.bf16.mxu1 %v729_v17  ;;  %v733_v25 = vpack.c.bf16 %v269_v22, %v267_v20  ;;  %v271_v26 = vld [vmem:[%s1506_s5 + $0x48] sm:$0xff]  ;;  %v273_v27 = vld [vmem:[%s1506_s5 + $0x58] sm:$0xff] }
  0x50   :  { %v735_v28 = vpack.c.bf16 %v268_v24, %v266_v23  ;;  %v737_v29 = vpack.c.bf16 %v273_v27, %v271_v26  ;;  %v270_v30 = vld [vmem:[%s1506_s5 + $0x40] sm:$0xff]  ;;  %v272_v31 = vld [vmem:[%s1506_s5 + $0x50] sm:$0xff]  ;;  %v275_v32 = vld [vmem:[%s1506_s5 + $0x68] sm:$0xff] }
  0x51   :  { %647 = vmatmul.mubr.msk.f32.vlgmr.msra.gmra.mrb[0].mxu1 %vm97_vm0, %v92_v12  ;;  %v277_v33 = vld [vmem:[%s1506_s5 + $0x78] sm:$0xff]  ;;  %v739_v34 = vpack.c.bf16 %v272_v31, %v270_v30  ;;  %v274_v36 = vld [vmem:[%s1506_s5 + $0x60] sm:$0xff]  ;;  %v276_v37 = vld [vmem:[%s1506_s5 + $0x70] sm:$0xff] }
  0x52   :  { %648 = vmatmul.mubr.msk.f32.vlgmr.msra.gmra.mrb[0].mxu0 %vm97_vm0, %v87_v14  ;;  %732 = vmatpush1.bf16.msra.mxu1 %v731_v21  ;;  %v741_v35 = vpack.c.bf16 %v277_v33, %v275_v32  ;;  %v279_v38 = vld [vmem:[%s1506_s5 + $0x88] sm:$0xff]  ;;  %v281_v39 = vld [vmem:[%s1506_s5 + $0x98] sm:$0xff]  ;;  %v743_v40 = vpack.c.bf16 %v276_v37, %v274_v36  ;;  %v278_v42 = vld [vmem:[%s1506_s5 + $0x80] sm:$0xff] }
  0x53   :  { %734 = vmatprep.subr.bf16.mxu1 %v733_v25  ;;  %v745_v41 = vpack.c.bf16 %v281_v39, %v279_v38  ;;  %v280_v43 = vld [vmem:[%s1506_s5 + $0x90] sm:$0xff]  ;;  %v283_v44 = vld [vmem:[%s1506_s5 + $0xa8] sm:$0xff]  ;;  %v285_v45 = vld [vmem:[%s1506_s5 + $0xb8] sm:$0xff] }
  0x54   :  { %v747_v46 = vpack.c.bf16 %v280_v43, %v278_v42  ;;  %v749_v47 = vpack.c.bf16 %v285_v45, %v283_v44  ;;  %v282_v48 = vld [vmem:[%s1506_s5 + $0xa0] sm:$0xff]  ;;  %v284_v49 = vld [vmem:[%s1506_s5 + $0xb0] sm:$0xff]  ;;  %v287_v50 = vld [vmem:[%s1506_s5 + $0xc8] sm:$0xff] }
  0x55   :  { %v289_v51 = vld [vmem:[%s1506_s5 + $0xd8] sm:$0xff]  ;;  %v751_v52 = vpack.c.bf16 %v284_v49, %v282_v48  ;;  %v286_v54 = vld [vmem:[%s1506_s5 + $0xc0] sm:$0xff]  ;;  %v288_v55 = vld [vmem:[%s1506_s5 + $0xd0] sm:$0xff] }
  0x56   :  { %736 = vmatpush1.bf16.msra.mxu1 %v735_v28  ;;  %v753_v53 = vpack.c.bf16 %v289_v51, %v287_v50  ;;  %v291_v56 = vld [vmem:[%s1506_s5 + $0xe8] sm:$0xff]  ;;  %v293_v57 = vld [vmem:[%s1506_s5 + $0xf8] sm:$0xff]  ;;  %v755_v58 = vpack.c.bf16 %v288_v55, %v286_v54  ;;  %v290_v60 = vld [vmem:[%s1506_s5 + $0xe0] sm:$0xff] }
  0x57   :  { %738 = vmatprep.subr.bf16.mxu1 %v737_v29  ;;  %v757_v59 = vpack.c.bf16 %v293_v57, %v291_v56  ;;  %v292_v61 = vld [vmem:[%s1506_s5 + $0xf0] sm:$0xff]  ;;  %v295_v62 = vld [vmem:[%s1506_s5 + $0x108] sm:$0xff]  ;;  %v297_v63 = vld [vmem:[%s1506_s5 + $0x118] sm:$0xff] }
  0x58   :  { %v759_v0 = vpack.c.bf16 %v292_v61, %v290_v60  ;;  %v761_v1 = vpack.c.bf16 %v297_v63, %v295_v62  ;;  %v294_v2 = vld [vmem:[%s1506_s5 + $0x100] sm:$0xff]  ;;  %v296_v3 = vld [vmem:[%s1506_s5 + $0x110] sm:$0xff]  ;;  %v299_v4 = vld [vmem:[%s1506_s5 + $0x128] sm:$0xff] }
  0x59   :  { %v301_v5 = vld [vmem:[%s1506_s5 + $0x138] sm:$0xff]  ;;  %v763_v6 = vpack.c.bf16 %v296_v3, %v294_v2  ;;  %v298_v8 = vld [vmem:[%s1506_s5 + $0x120] sm:$0xff]  ;;  %v300_v9 = vld [vmem:[%s1506_s5 + $0x130] sm:$0xff] }
  0x5a   :  { %740 = vmatpush1.bf16.msra.mxu1 %v739_v34  ;;  %v765_v7 = vpack.c.bf16 %v301_v5, %v299_v4  ;;  %v303_v10 = vld [vmem:[%s1506_s5 + $0x148] sm:$0xff]  ;;  %v305_v11 = vld [vmem:[%s1506_s5 + $0x158] sm:$0xff]  ;;  %v767_v12 = vpack.c.bf16 %v300_v9, %v298_v8  ;;  %v302_v14 = vld [vmem:[%s1506_s5 + $0x140] sm:$0xff] }
  0x5b   :  { %742 = vmatprep.subr.bf16.mxu1 %v741_v35  ;;  %v769_v13 = vpack.c.bf16 %v305_v11, %v303_v10  ;;  %v304_v15 = vld [vmem:[%s1506_s5 + $0x150] sm:$0xff]  ;;  %v307_v16 = vld [vmem:[%s1506_s5 + $0x168] sm:$0xff]  ;;  %v309_v17 = vld [vmem:[%s1506_s5 + $0x178] sm:$0xff] }
  0x5c   :  { %v771_v18 = vpack.c.bf16 %v304_v15, %v302_v14  ;;  %v773_v19 = vpack.c.bf16 %v309_v17, %v307_v16  ;;  %v306_v20 = vld [vmem:[%s1506_s5 + $0x160] sm:$0xff]  ;;  %v308_v21 = vld [vmem:[%s1506_s5 + $0x170] sm:$0xff]  ;;  %v311_v22 = vld [vmem:[%s1506_s5 + $0x188] sm:$0xff] }
  0x5d   :  { %v313_v23 = vld [vmem:[%s1506_s5 + $0x198] sm:$0xff]  ;;  %v775_v24 = vpack.c.bf16 %v308_v21, %v306_v20  ;;  %v310_v26 = vld [vmem:[%s1506_s5 + $0x180] sm:$0xff]  ;;  %v312_v27 = vld [vmem:[%s1506_s5 + $0x190] sm:$0xff] }
  0x5e   :  { %744 = vmatpush1.bf16.msra.mxu1 %v743_v40  ;;  %v777_v25 = vpack.c.bf16 %v313_v23, %v311_v22  ;;  %v315_v28 = vld [vmem:[%s1506_s5 + $0x1a8] sm:$0xff]  ;;  %v317_v29 = vld [vmem:[%s1506_s5 + $0x1b8] sm:$0xff]  ;;  %v779_v30 = vpack.c.bf16 %v312_v27, %v310_v26  ;;  %v314_v32 = vld [vmem:[%s1506_s5 + $0x1a0] sm:$0xff] }
  0x5f   :  { %746 = vmatprep.subr.bf16.mxu1 %v745_v41  ;;  %v781_v31 = vpack.c.bf16 %v317_v29, %v315_v28  ;;  %v316_v33 = vld [vmem:[%s1506_s5 + $0x1b0] sm:$0xff]  ;;  %v319_v35 = vld [vmem:[%s1506_s5 + $0x1c8] sm:$0xff]  ;;  %v321_v36 = vld [vmem:[%s1506_s5 + $0x1d8] sm:$0xff] }
  0x60   :  { %v783_v34 = vpack.c.bf16 %v316_v33, %v314_v32  ;;  %v785_v37 = vpack.c.bf16 %v321_v36, %v319_v35  ;;  %v318_v38 = vld [vmem:[%s1506_s5 + $0x1c0] sm:$0xff]  ;;  %v320_v39 = vld [vmem:[%s1506_s5 + $0x1d0] sm:$0xff]  ;;  %v323_v41 = vld [vmem:[%s1506_s5 + $0x1e8] sm:$0xff] }
  0x61   :  { %v787_v40 = vpack.c.bf16 %v320_v39, %v318_v38  ;;  %v325_v42 = vld [vmem:[%s1506_s5 + $0x1f8] sm:$0xff]  ;;  %v322_v44 = vld [vmem:[%s1506_s5 + $0x1e0] sm:$0xff]  ;;  %v324_v45 = vld [vmem:[%s1506_s5 + $0x1f0] sm:$0xff] }
  0x62   :  { %748 = vmatpush1.bf16.msra.mxu1 %v747_v46  ;;  %v789_v43 = vpack.c.bf16 %v325_v42, %v323_v41  ;;  %v791_v46 = vpack.c.bf16 %v324_v45, %v322_v44  ;;  %v428_v48 = vld [vmem:[%s1508_s7 + $0x88] sm:$0xff]  ;;  %v411_v49 = vld [vmem:[%s1508_s7] sm:$0xff]  ;;  %v413_v56 = vld [vmem:[%s1508_s7 + $0x10] sm:$0xff] }
  0x63   :  { %750 = vmatprep.subr.bf16.mxu1 %v749_v47  ;;  %v427_v47 = vld [vmem:[%s1508_s7 + $0x80] sm:$0xff]  ;;  %v412_v51 = vld [vmem:[%s1508_s7 + $0x8] sm:$0xff]  ;;  %v414_v57 = vld [vmem:[%s1508_s7 + $0x18] sm:$0xff] }
  0x64   :  { %v793_v50 = vpack.c.bf16 %v428_v48, %v427_v47  ;;  %v795_v54 = vpack.c.bf16 %v412_v51, %v411_v49  ;;  %v799_v60 = vpack.c.bf16 %v414_v57, %v413_v56  ;;  %v415_v62 = vld [vmem:[%s1508_s7 + $0x20] sm:$0xff]  ;;  %v416_v63 = vld [vmem:[%s1508_s7 + $0x28] sm:$0xff]  ;;  %v417_v4 = vld [vmem:[%s1508_s7 + $0x30] sm:$0xff] }
  0x65   :  { %v803_v2 = vpack.c.bf16 %v416_v63, %v415_v62  ;;  %v418_v5 = vld [vmem:[%s1508_s7 + $0x38] sm:$0xff]  ;;  %v419_v10 = vld [vmem:[%s1508_s7 + $0x40] sm:$0xff]  ;;  %v420_v11 = vld [vmem:[%s1508_s7 + $0x48] sm:$0xff] }
  0x66   :  { %752 = vmatpush1.bf16.msra.mxu1 %v751_v52  ;;  %v429_v52 = vld [vmem:[%s1508_s7 + $0x90] sm:$0xff]  ;;  %794 = vmatprep.subr.bf16.mxu0 %v793_v50  ;;  %v807_v8 = vpack.c.bf16 %v418_v5, %v417_v4  ;;  %v811_v14 = vpack.c.bf16 %v420_v11, %v419_v10  ;;  %v422_v17 = vld [vmem:[%s1508_s7 + $0x58] sm:$0xff]  ;;  %v423_v22 = vld [vmem:[%s1508_s7 + $0x60] sm:$0xff] }
  0x67   :  { %754 = vmatprep.subr.bf16.mxu1 %v753_v53  ;;  %v430_v53 = vld [vmem:[%s1508_s7 + $0x98] sm:$0xff]  ;;  %796 = vmatpush3.bf16.msra.mxu0 %v795_v54  ;;  %v421_v16 = vld [vmem:[%s1508_s7 + $0x50] sm:$0xff]  ;;  %v424_v23 = vld [vmem:[%s1508_s7 + $0x68] sm:$0xff] }
  0x68   :  { %v797_v55 = vpack.c.bf16 %v430_v53, %v429_v52  ;;  %v815_v20 = vpack.c.bf16 %v422_v17, %v421_v16  ;;  %v246_v28 = vld [vmem:[#allocation2] sm:$0x3]  ;;  %v536_v48 = vld [vmem:[%s1510_s9 + $0x80] sm:$0xff]  ;;  %v537_v49 = vld [vmem:[%s1510_s9 + $0x88] sm:$0xff] }
  0x69   :  { %v441_v42 = vld [vmem:[%s1508_s7 + $0xf0] sm:$0xff]  ;;  %v825_v50 = vpack.c.bf16 %v537_v49, %v536_v48  ;;  %v520_v57 = vld [vmem:[%s1510_s9] sm:$0xff]  ;;  %v541_v5 = vld [vmem:[%s1510_s9 + $0xa8] sm:$0xff] }
  0x6a   :  { %756 = vmatpush1.bf16.msra.mxu1 %v755_v58  ;;  %v431_v58 = vld [vmem:[%s1508_s7 + $0xa0] sm:$0xff]  ;;  %798 = vmatprep.subr.bf16.mxu0 %v797_v55  ;;  %v425_v45 = vld [vmem:[%s1508_s7 + $0x70] sm:$0xff]  ;;  %v543_v11 = vld [vmem:[%s1510_s9 + $0xb8] sm:$0xff] }
  0x6b   :  { %758 = vmatprep.subr.bf16.mxu1 %v757_v59  ;;  %v432_v59 = vld [vmem:[%s1508_s7 + $0xa8] sm:$0xff]  ;;  %800 = vmatpush3.bf16.msra.mxu0 %v799_v60  ;;  %v326_v51 = vld [vmem:[#allocation4] sm:$0x3]  ;;  %v540_v4 = vld [vmem:[%s1510_s9 + $0xa0] sm:$0xff] }
  0x6c   :  { %v801_v61 = vpack.c.bf16 %v432_v59, %v431_v58  ;;  %v521_v58 = vld [vmem:[%s1510_s9 + $0x8] sm:$0xff]  ;;  %v538_v60 = vld [vmem:[%s1510_s9 + $0x90] sm:$0xff]  ;;  %v544_v16 = vld [vmem:[%s1510_s9 + $0xc0] sm:$0xff] }
  0x6d   :  { %v827_v63 = vpack.c.bf16 %v521_v58, %v520_v57  ;;  %v542_v10 = vld [vmem:[%s1510_s9 + $0xb0] sm:$0xff]  ;;  %v545_v17 = vld [vmem:[%s1510_s9 + $0xc8] sm:$0xff] }
  0x6e   :  { %760 = vmatpush1.bf16.msra.mxu1 %v759_v0  ;;  %v433_v0 = vld [vmem:[%s1508_s7 + $0xb0] sm:$0xff]  ;;  %802 = vmatprep.subr.bf16.mxu0 %v801_v61  ;;  %v539_v61 = vld [vmem:[%s1510_s9 + $0x98] sm:$0xff] }
  0x6f   :  { %762 = vmatprep.subr.bf16.mxu1 %v761_v1  ;;  %v434_v1 = vld [vmem:[%s1508_s7 + $0xb8] sm:$0xff]  ;;  %804 = vmatpush3.bf16.msra.mxu0 %v803_v2  ;;  %v522_v2 = vld [vmem:[%s1510_s9 + $0x10] sm:$0xff] }
  0x70   :  { %v805_v3 = vpack.c.bf16 %v434_v1, %v433_v0  ;;  %v829_v1 = vpack.c.bf16 %v539_v61, %v538_v60 }
  0x72   :  { %764 = vmatpush1.bf16.msra.mxu1 %v763_v6  ;;  %v435_v6 = vld [vmem:[%s1508_s7 + $0xc0] sm:$0xff]  ;;  %806 = vmatprep.subr.bf16.mxu0 %v805_v3  ;;  %v523_v3 = vld [vmem:[%s1510_s9 + $0x18] sm:$0xff] }
  0x73   :  { %766 = vmatprep.subr.bf16.mxu1 %v765_v7  ;;  %v436_v7 = vld [vmem:[%s1508_s7 + $0xc8] sm:$0xff]  ;;  %808 = vmatpush3.bf16.msra.mxu0 %v807_v8  ;;  %v524_v8 = vld [vmem:[%s1510_s9 + $0x20] sm:$0xff] }
  0x74   :  { %v809_v9 = vpack.c.bf16 %v436_v7, %v435_v6  ;;  %v831_v6 = vpack.c.bf16 %v523_v3, %v522_v2  ;;  %v833_v7 = vpack.c.bf16 %v541_v5, %v540_v4 }
  0x76   :  { %768 = vmatpush1.bf16.msra.mxu1 %v767_v12  ;;  %v437_v12 = vld [vmem:[%s1508_s7 + $0xd0] sm:$0xff]  ;;  %810 = vmatprep.subr.bf16.mxu0 %v809_v9  ;;  %v525_v9 = vld [vmem:[%s1510_s9 + $0x28] sm:$0xff] }
  0x77   :  { %770 = vmatprep.subr.bf16.mxu1 %v769_v13  ;;  %v438_v13 = vld [vmem:[%s1508_s7 + $0xd8] sm:$0xff]  ;;  %812 = vmatpush3.bf16.msra.mxu0 %v811_v14  ;;  %v526_v14 = vld [vmem:[%s1510_s9 + $0x30] sm:$0xff] }
  0x78   :  { %v813_v15 = vpack.c.bf16 %v438_v13, %v437_v12  ;;  %v835_v12 = vpack.c.bf16 %v525_v9, %v524_v8  ;;  %v837_v13 = vpack.c.bf16 %v543_v11, %v542_v10 }
  0x7a   :  { %772 = vmatpush1.bf16.msra.mxu1 %v771_v18  ;;  %v439_v18 = vld [vmem:[%s1508_s7 + $0xe0] sm:$0xff]  ;;  %814 = vmatprep.subr.bf16.mxu0 %v813_v15  ;;  %v527_v15 = vld [vmem:[%s1510_s9 + $0x38] sm:$0xff] }
  0x7b   :  { %774 = vmatprep.subr.bf16.mxu1 %v773_v19  ;;  %v440_v19 = vld [vmem:[%s1508_s7 + $0xe8] sm:$0xff]  ;;  %816 = vmatpush3.bf16.msra.mxu0 %v815_v20  ;;  %v528_v20 = vld [vmem:[%s1510_s9 + $0x40] sm:$0xff] }
  0x7c   :  { %v817_v21 = vpack.c.bf16 %v440_v19, %v439_v18  ;;  %v839_v18 = vpack.c.bf16 %v527_v15, %v526_v14  ;;  %v841_v19 = vpack.c.bf16 %v545_v17, %v544_v16 }
  0x7e   :  { %776 = vmatpush1.bf16.msra.mxu1 %v775_v24  ;;  %v819_v24 = vpack.c.bf16 %v424_v23, %v423_v22  ;;  %818 = vmatprep.subr.bf16.mxu0 %v817_v21  ;;  %v529_v21 = vld [vmem:[%s1510_s9 + $0x48] sm:$0xff]  ;;  %v546_v22 = vld [vmem:[%s1510_s9 + $0xd0] sm:$0xff]  ;;  %v547_v23 = vld [vmem:[%s1510_s9 + $0xd8] sm:$0xff] }
  0x7f   :  { %778 = vmatprep.subr.bf16.mxu1 %v777_v25  ;;  %v248_v25 = vlaneseq }
  0x80   :  { %820 = vmatpush3.bf16.msra.mxu0 %v819_v24  ;;  %v843_v24 = vpack.c.bf16 %v529_v21, %v528_v20 }
  0x81   :  { %v249_v26 = vshrl.u32 %v248_v25, 7  ;;  %v845_v25 = vpack.c.bf16 %v547_v23, %v546_v22 }
  0x82   :  { %780 = vmatpush1.bf16.msra.mxu1 %v779_v30 }
  0x83   :  { %782 = vmatprep.subr.bf16.mxu1 %v781_v31  ;;  %v250_v27 = vsub.s32 0, %v249_v26  ;;  %v254_v29 = vsub.s32 1, %v249_v26  ;;  %v530_v26 = vld [vmem:[%s1510_s9 + $0x50] sm:$0xff] }
  0x85   :  { %v251_v31 = vrot.slane %v246_v28, %v250_v27  ;;  %v331_v52 = vrot.slane %v326_v51, %v250_v27  ;;  %v335_v53 = vrot.slane %v326_v51, %v254_v29  ;;  %v531_v27 = vld [vmem:[%s1510_s9 + $0x58] sm:$0xff] }
  0x86   :  { %784 = vmatpush1.bf16.msra.mxu1 %v783_v34  ;;  %v255_v34 = vrot.slane %v246_v28, %v254_v29  ;;  %v548_v28 = vld [vmem:[%s1510_s9 + $0xe0] sm:$0xff]  ;;  %v549_v29 = vld [vmem:[%s1510_s9 + $0xe8] sm:$0xff] }
  0x87   :  { %786 = vmatprep.subr.bf16.mxu1 %v785_v37 }
  0x8a   :  { %788 = vmatpush1.bf16.msra.mxu1 %v787_v40 }
  0x8b   :  { %790 = vmatprep.subr.bf16.mxu1 %v789_v43  ;;  %v442_v43 = vld [vmem:[%s1508_s7 + $0xf8] sm:$0xff] }
  0x8c   :  { %v821_v44 = vpack.c.bf16 %v442_v43, %v441_v42  ;;  %v649_v42 = vld [vmem:[#allocation6] ss:$0 sm:$0xff] }
  0x8e   :  { %792 = vmatpush1.bf16.msra.mxu1 %v791_v46  ;;  %v426_v46 = vld [vmem:[%s1508_s7 + $0x78] sm:$0xff]  ;;  %822 = vmatprep.subr.bf16.mxu0 %v821_v44 }
  0x8f   :  { %v823_v47 = vpack.c.bf16 %v426_v46, %v425_v45 }
  0x91   :  { %824 = vmatpush3.bf16.msra.mxu0 %v823_v47  ;;  %v650_v47 = vld [vmem:[#allocation7] ss:$0 sm:$0xff] }
  0x92   :  { %826 = vmatprep.subr.bf16.mxu0 %v825_v50 }
 0x124   :  { %v167_v30 = vpop.f32.mrb[0].mxu1 }
 0x125   :  { %v241_v32 = vpop.f32.mrb[0].mxu0  ;;  %v169_v33 = vpop.f32.mrb[1].mxu1 }
 0x126   :  { %v242_v35 = vadd.f32 %v241_v32, %v167_v30  ;;  %v243_v36 = vpop.f32.mrb[1].mxu0  ;;  %v847_v30 = vpack.c.bf16 %v531_v27, %v530_v26  ;;  %v532_v32 = vld [vmem:[%s1510_s9 + $0x60] sm:$0xff] }
 0x127   :  { %v244_v37 = vadd.f32 %v243_v36, %v169_v33  ;;  %v533_v33 = vld [vmem:[%s1510_s9 + $0x68] sm:$0xff] }
 0x128   :  { %v258_v38 = vadd.f32 %v251_v31, %v242_v35  ;;  %v849_v31 = vpack.c.bf16 %v549_v29, %v548_v28  ;;  %v551_v35 = vld [vmem:[%s1510_s9 + $0xf8] sm:$0xff]  ;;  %v851_v36 = vpack.c.bf16 %v533_v33, %v532_v32 }
 0x129   :  { %v259_v39 = vadd.f32 %v255_v34, %v244_v37  ;;  %v550_v34 = vld [vmem:[%s1510_s9 + $0xf0] sm:$0xff] }
 0x12a   :  { %v260_v41 = vmax.f32 %v258_v38, 0.0  ;;  %v853_v37 = vpack.c.bf16 %v551_v35, %v550_v34  ;;  %v534_v38 = vld [vmem:[%s1510_s9 + $0x70] sm:$0xff] }
 0x12b   :  { %v261_v40 = vmax.f32 %v259_v39, 0.0  ;;  %v535_v39 = vld [vmem:[%s1510_s9 + $0x78] sm:$0xff] }
 0x12d   :  { %402 = vmatprep.mubr.f32.mxu1 %v261_v40  ;;  %v855_v40 = vpack.c.bf16 %v535_v39, %v534_v38 }
 0x12e   :  { %403 = vmatmul.mubr.f32.vlgmr.msra.gmra.mrb[2].mxu1 %v260_v41 }
 0x201   :  { %v404_v54 = vpop.f32.mrb[2].mxu1 }
 0x202   :  { %v1402_v55 = vadd.f32 %v404_v54, %v331_v52  ;;  %v406_v56 = vpop.f32.mrb[3].mxu1 }
 0x203   :  { %v407_v59 = vadd.f32 %v406_v56, %v335_v53 }
 0x204   :  { %v409_v0 = vmax.f32 %v1402_v55, 0.0 }
 0x205   :  { %v410_v62 = vmax.f32 %v407_v59, 0.0 }
 0x207   :  { %514 = vmatprep.mubr.f32.mxu0 %v410_v62 }
 0x208   :  { %515 = vmatmul.mubr.f32.vlgmr.msra.gmra.mrb[2].mxu0 %v409_v0 }
 0x209   :  { %828 = vmatpush3.bf16.msra.mxu0 %v827_v63  ;;  %623 = vmatprep.mubr.f32.mxu0 %v410_v62 }
 0x20a   :  { %830 = vmatprep.subr.bf16.mxu0 %v829_v1 }
 0x20d   :  { %832 = vmatpush3.bf16.msra.mxu0 %v831_v6 }
 0x20e   :  { %834 = vmatprep.subr.bf16.mxu0 %v833_v7 }
 0x211   :  { %836 = vmatpush3.bf16.msra.mxu0 %v835_v12 }
 0x212   :  { %838 = vmatprep.subr.bf16.mxu0 %v837_v13 }
 0x215   :  { %840 = vmatpush3.bf16.msra.mxu0 %v839_v18 }
 0x216   :  { %842 = vmatprep.subr.bf16.mxu0 %v841_v19 }
 0x219   :  { %844 = vmatpush3.bf16.msra.mxu0 %v843_v24 }
 0x21a   :  { %846 = vmatprep.subr.bf16.mxu0 %v845_v25 }
 0x21d   :  { %848 = vmatpush3.bf16.msra.mxu0 %v847_v30 }
 0x21e   :  { %850 = vmatprep.subr.bf16.mxu0 %v849_v31 }
 0x221   :  { %852 = vmatpush3.bf16.msra.mxu0 %v851_v36 }
 0x222   :  { %854 = vmatprep.subr.bf16.mxu0 %v853_v37 }
 0x225   :  { %856 = vmatpush3.bf16.msra.mxu0 %v855_v40 }
 0x228   :  { %624 = vmatmul.mubr.f32.vlgmr.msra.gmra.mrb[4].mxu0 %v409_v0 }
 0x2db   :  { %v683_v41 = vpop.f32.mrb[2].mxu0 }
 0x2dc   :  { %v684_v43 = vpop.f32.mrb[3].mxu0 }
 0x2dd   :  { %v685_v44 = vadd.f32 %v684_v43, %v683_v41 }
 0x2df   :  { %v517_v45 = vadd.f32 %v685_v44, %v649_v42 }
 0x2e1   :  { %632 = vst.msk [vmem:[%s1512_s11] sm:$0xff] %vm631_vm1, %v517_v45 }
 0x2fb   :  { %v718_v46 = vpop.f32.mrb[4].mxu0 }
 0x2fc   :  { %v719_v48 = vpop.f32.mrb[5].mxu0 }
 0x2fd   :  { %v720_v49 = vadd.f32 %v719_v48, %v718_v46 }
 0x2ff   :  { %v626_v50 = vadd.f32 %v720_v49, %v650_v47 }
 0x301   :  { %v629_v51 = vmax.f32 %v626_v50, -20.0 }
 0x303   :  { %v630_v52 = vmin.f32 %v629_v51, 2.0 }
 0x305   :  { %v633_v53 = vmul.f32 1.442695, %v630_v52 }
 0x307   :  { %864 = vpow2.f32 %v633_v53 }
 0x311   :  { %v865_v54 = vpop.eup %864 }
 0x312   :  { %635 = vst.msk [vmem:[%s1513_s12] sm:$0xff] %vm631_vm1, %v865_v54 }
 0x313   :  { %644 = vsyncpa [#allocation3], 1 }
 0x314   :  { %645 = vsyncpa [#allocation5], 1 }
 0x315   :  { %646 = vsyncpa [#allocation8], 1 }

</bundles_post_ra>
